<compile_context>
chip_gen: v7x
topology: tpu7x:2x2x1
jax: 0.10.0
libtpu: 0.0.40
codegen_flags: <defaults>
</compile_context>

<pallas_src>
import jax
import jax.numpy as jnp
from jax.experimental import pallas as pl
from jax.experimental.pallas import tpu as pltpu


def _round_up(x: int, m: int) -> int:
    return ((x + m - 1) // m) * m


def _bcast_row_kernel(row_ref, out_ref):
    # row_ref: (1, L) VMEM tile holding one lane-dense row pattern
    #          (the constant, possibly tiled across the 128-lane axis).
    # out_ref: (TR, L) VMEM tile; every row gets a copy of that pattern.
    out_ref[...] = jnp.broadcast_to(row_ref[...], out_ref.shape).astype(out_ref.dtype)


def dummy_regressor_predict(x: jax.Array, constant: jax.Array) -> jax.Array:
    """Equivalent of TorchDummyRegressor.predict(x) with buffer `constant`."""
    n = x.shape[0]
    constant = constant.reshape(-1)            # torch .view(-1) in wrap()
    k = constant.shape[0]
    dtype = constant.dtype
    itemsize = jnp.dtype(dtype).itemsize

    if k <= 128 and 128 % k == 0:
        # ---- Lane-dense packed path (covers K==1, 2, 4, ..., 128) ----------
        # Flattened output = tile(constant, N); pack it into 128-wide rows so
        # every store is a full, unmasked lane-wide store.
        reps = 128 // k
        row = jnp.tile(constant, reps).reshape(1, 128)

        total = n * k
        rows_total = pl.cdiv(total, 128)
        # Tile rows in multiples of 8 (sublane alignment); cap per-buffer size
        # at ~1 MiB so double-buffering is trivial on every chip (incl. v7x).
        tr = min(_round_up(max(rows_total, 1), 8), 2048)
        rows_pad = _round_up(rows_total, tr)
        grid = (rows_pad // tr,)

        out2d = pl.pallas_call(
            _bcast_row_kernel,
            out_shape=jax.ShapeDtypeStruct((rows_pad, 128), dtype),
            grid=grid,
            in_specs=[pl.BlockSpec((1, 128), lambda i: (0, 0))],   # VMEM-resident
            out_specs=pl.BlockSpec((tr, 128), lambda i: (i, 0)),
            compiler_params=pltpu.CompilerParams(
                dimension_semantics=("parallel",)),
            cost_estimate=pl.CostEstimate(
                flops=0, transcendentals=0,
                bytes_accessed=rows_pad * 128 * itemsize),
        )(row)

        flat = out2d.reshape(-1)[:total]
        return flat if k == 1 else flat.reshape(n, k)

    # ---- General path: tile the batch axis, (TN, K) output blocks ----------
    const2d = constant.reshape(1, k)
    bytes_per_row = k * itemsize
    # Keep each output buffer <= ~4 MiB (double-buffered => <= ~8 MiB), which
    # comfortably fits the 32 MiB default scoped VMEM on v7x/v6e (16 MiB v5e).
    cap_rows = max(8, ((4 * 1024 * 1024) // max(bytes_per_row, 1)) // 8 * 8)
    tn = min(cap_rows, _round_up(max(n, 1), 8), 4096)
    grid = (pl.cdiv(n, tn),)

    out = pl.pallas_call(
        _bcast_row_kernel,
        out_shape=jax.ShapeDtypeStruct((n, k), dtype),
        grid=grid,
        in_specs=[pl.BlockSpec((1, k), lambda i: (0, 0))],         # VMEM-resident
        out_specs=pl.BlockSpec((tn, k), lambda i: (i, 0)),
        compiler_params=pltpu.CompilerParams(
            dimension_semantics=("parallel",)),
        cost_estimate=pl.CostEstimate(
            flops=0, transcendentals=0, bytes_accessed=n * k * itemsize),
    )(const2d)

    if k == 1:
        out = out.reshape(-1)                  # torch res.view(-1) when 1 output
    return out


if __name__ == "__main__":
    key = jax.random.PRNGKey(0)
    kx, kc = jax.random.split(key)

    # Small, deterministic example: batch=8, features=32, 4 regression targets.
    N, D, K = 8, 32, 4
    x = jax.random.normal(kx, (N, D), dtype=jnp.float32)
    constant = jax.random.normal(kc, (K,), dtype=jnp.float32)

    # Multi-output, lane-dense packed path (128 % 4 == 0): (N, K)
    out_multi = jax.block_until_ready(dummy_regressor_predict(x, constant))
    ref_multi = jnp.broadcast_to(constant[None, :], (N, K))
    assert out_multi.shape == (N, K)
    assert jnp.allclose(out_multi, ref_multi)

    # Single-output case (K == 1): lane-dense packed path, squeezed to (N,)
    const1 = constant[:1]
    out_single = jax.block_until_ready(dummy_regressor_predict(x, const1))
    ref_single = jnp.broadcast_to(const1[None, :], (N, 1)).reshape(-1)
    assert out_single.shape == (N,)
    assert jnp.allclose(out_single, ref_single)

    # Larger batch, K == 1: exercises multi-row packing + padding/slice-back.
    N_big = 300
    x_big = jax.random.normal(kx, (N_big, D), dtype=jnp.float32)
    out_big = jax.block_until_ready(dummy_regressor_predict(x_big, const1))
    assert out_big.shape == (N_big,)
    assert jnp.allclose(out_big, jnp.full((N_big,), const1[0]))

    # K = 3 (128 % 3 != 0): exercises the general row-tiled path.
    const3 = jax.random.normal(kc, (3,), dtype=jnp.float32)
    out_k3 = jax.block_until_ready(dummy_regressor_predict(x, const3))
    assert out_k3.shape == (N, 3)
    assert jnp.allclose(out_k3, jnp.broadcast_to(const3[None, :], (N, 3)))

    print("KERNEL_OK")
</pallas_src>

<mosaic_0001>
module attributes {stable_mosaic.version = 11 : i64} {
  func.func @_bcast_row_kernel(%arg0: i32, %arg1: memref<1x128xf32, #tpu.memory_space<vmem>>, %arg2: memref<8x128xf32, #tpu.memory_space<vmem>>) attributes {dimension_semantics = [#tpu.dimension_semantics<parallel>], iteration_bounds = array<i64: 1>, scalar_prefetch = 0 : i64, scratch_operands = 0 : i64, tpu.core_type = #tpu.core_type<tc>, window_params = [{pipeline_mode = #tpu.pipeline_mode<synchronous>, transform_indices = @transform_0, window_bounds = array<i64: 1, 128>}, {transform_indices = @transform_1, window_bounds = array<i64: 8, 128>}]} {
    %c0 = arith.constant 0 : index
    %c0_0 = arith.constant 0 : index
    %0 = vector.load %arg1[%c0, %c0_0] : memref<1x128xf32, #tpu.memory_space<vmem>>, vector<1x128xf32>
    %1 = vector.shape_cast %0 : vector<1x128xf32> to vector<1x128xf32>
    %2 = vector.broadcast %1 : vector<1x128xf32> to vector<8x128xf32>
    %c0_1 = arith.constant 0 : index
    %c0_2 = arith.constant 0 : index
    %3 = vector.load %arg2[%c0_1, %c0_2] : memref<8x128xf32, #tpu.memory_space<vmem>>, vector<8x128xf32>
    tpu.vector_store %arg2[%c0_1, %c0_2], %2 {strides = array<i32>} : memref<8x128xf32, #tpu.memory_space<vmem>>, vector<8x128xf32>,
    return
  }
  func.func @transform_0(%arg0: i32) -> (i32, i32) {
    %c0_i32 = arith.constant 0 : i32
    %c0_i32_0 = arith.constant 0 : i32
    %c0_i32_1 = arith.constant 0 : i32
    return %c0_i32, %c0_i32_0 : i32, i32
  }
  func.func @transform_1(%arg0: i32) -> (i32, i32) {
    %c0_i32 = arith.constant 0 : i32
    %c0_i32_0 = arith.constant 0 : i32
    return %arg0, %c0_i32 : i32, i32
  }
}

</mosaic_0001>

<bundles_post_ra>
// kernel: tpu_custom_call.1
= control target key start
LH: loop header
LB: loop body
LE: loop exit
PB: predicated region body
PF: predicated region fallthrough
CT: control target
= control target key end

     0   :  { %6 = vsyncpa [#allocation3], 0  ;;  %s131_s0 = inlined_call_operand.hbm [shape: f32[1,128], index: 0, kind: input, shape index: {}]   ;;  %s132_s1 = inlined_call_operand.hbm [shape: f32[8,128], index: 1, kind: output, shape index: {}]  }
   0x1   :  { %7 = vsyncpa [#allocation4], 0  ;;  %s95_s6 = smov [#allocation2]   ;;  %s47_s10 = scalar_lea.hbm %s131_s0, 16 }
   0x2   :  { %s14_s7 = sshll.u32 %s95_s6, 4  ;;  %p48_p0 = scmp.ne.s32.totalorder %s131_s0, %s47_s10  ;;  %s15_s7 = int_to_ptr.vmem [resolvable:$true] %s14_s7 }
   0x3   :  { %p51_p1 = scmp.lt.u32.totalorder %s47_s10, %s131_s0 }
   0x5   :  { %p53_p2 = pnand %p51_p1, %p48_p0 }
   0x7   :  { %56 = shalt.err (!%p53_p2)
}
   0x8   :  { %s57_s15 = scalar_lea.vmem %s15_s7, 16  ;;  %s61_s16 = scalar_lea.vmem %s15_s7, 32 }
   0x9   :  { %p58_p3 = scmp.ne.s32.totalorder %s15_s7, %s57_s15  ;;  %p62_p4 = scmp.lt.s32.totalorder %s15_s7, %s15_s7 }
   0xa   :  { %p63_p5 = scmp.lt.s32.totalorder %s61_s16, %s57_s15 }
   0xc   :  { %p64_p6 = por %p63_p5, %p62_p4 }
   0xe   :  { %p65_p7 = pnand %p64_p6, %p58_p3 }
  0x10   :  { %68 = shalt.err (!%p65_p7)
}
  0x11   :  { %17 = dma.hbm_to_vmem [thread:$0]  %s131_s0, 16, %s15_s7, [#allocation3]  }
  0x12   :  { %91 = dma.done.wait [#allocation3], 16  }
  0x13   :  { %92 = vsyncadd [#allocation3], 4294967280  ;;  %s96_s19 = smov [#allocation5]   ;;  %v44_v0 = vld [vmem:[#allocation2] ss:$0 sm:$0xff] }
  0x14   :  { %s35_s20 = sshll.u32 %s96_s19, 4  ;;  %28 = vst [vmem:[#allocation5] sm:$0xff] %v44_v0  ;;  %s36_s20 = int_to_ptr.vmem [resolvable:$true] %s35_s20 }
  0x15   :  { %s69_s21 = scalar_lea.vmem %s36_s20, 128  ;;  %p74_p9 = scmp.lt.s32.totalorder %s36_s20, %s36_s20 }
  0x16   :  { %p70_p8 = scmp.ne.s32.totalorder %s36_s20, %s69_s21  ;;  %p75_p10 = scmp.lt.s32.totalorder %s69_s21, %s69_s21 }
  0x18   :  { %p76_p11 = por %p75_p10, %p74_p9 }
  0x1a   :  { %p77_p12 = pnand %p76_p11, %p70_p8 }
  0x1c   :  { %80 = shalt.err (!%p77_p12)
}
  0x1d   :  { %s81_s24 = scalar_lea.hbm %s132_s1, 128 }
  0x1e   :  { %p82_p13 = scmp.ne.s32.totalorder %s132_s1, %s81_s24  ;;  %p85_p0 = scmp.lt.u32.totalorder %s81_s24, %s132_s1 }
  0x20   :  { %p87_p1 = pnand %p85_p0, %p82_p13 }
  0x22   :  { %90 = shalt.err (!%p87_p1)
}
  0x23   :  { %38 = dma.vmem_to_hbm [thread:$0]  %s36_s20, 128, %s132_s1, [#allocation4]  }
  0x24   :  { %93 = dma.done.wait [#allocation4], 128  }
  0x25   :  { %94 = vsyncadd [#allocation4], 4294967168 }
  0x26   :  { %42 = vsyncpa [#allocation3], 1 }
  0x27   :  { %43 = vsyncpa [#allocation4], 1 }

</bundles_post_ra>
